<compile_context>
chip_gen: v7x
topology: tpu7x:2x2x1
jax: 0.10.0
libtpu: 0.0.40
codegen_flags: <defaults>
</compile_context>

<pallas_src>
import functools

import jax
import jax.numpy as jnp
from jax import lax
from jax.experimental import pallas as pl
from jax.experimental.pallas import tpu as pltpu


def _cdiv(a, b):
    return -(-a // b)


def _round_up(a, b):
    return _cdiv(a, b) * b


def _lane_chunks(tile_hw, lane_chunk):
    chunks, lo = [], 0
    while lo < tile_hw:
        ln = min(lane_chunk, tile_hw - lo)
        chunks.append((lo, ln))
        lo += ln
    return chunks


def _channel_sum(x_ref, nrows, lane_lo, lane_len, c_inner, unroll):
    """f32 sum over the first `nrows` channel rows of the (1, C_blk, HW_blk)
    block, restricted to the lane window [lane_lo, lane_lo + lane_len).

    Hot loop = elementwise VALU adds into a small (1, c_inner, lane_len) f32
    register accumulator; the cross-sublane (XLU) collapse happens once per
    call (plus once for a static remainder), not once per chunk."""
    lanes = slice(lane_lo, lane_lo + lane_len)
    n_full = nrows // c_inner
    rem = nrows - n_full * c_inner

    total = None
    if n_full > 0:
        def body(i, acc):
            r0 = pl.multiple_of(i * c_inner, c_inner)
            chunk = x_ref[:, pl.ds(r0, c_inner), lanes].astype(jnp.float32)
            return acc + chunk

        acc = lax.fori_loop(
            0, n_full, body,
            jnp.zeros((1, c_inner, lane_len), jnp.float32),
            unroll=max(1, min(unroll, n_full)),
        )
        total = jnp.sum(acc, axis=1, keepdims=True)

    if rem > 0:
        tail = x_ref[:, n_full * c_inner:nrows, lanes].astype(jnp.float32)
        tail = jnp.sum(tail, axis=1, keepdims=True)
        total = tail if total is None else total + tail
    return total


def _avg_single_kernel(x_ref, o_ref, *, c_total, inv_c, c_inner, lane_chunk,
                       unroll):
    # Single channel block: no scratch, no init/finalize — sum in registers
    # and write the scaled result straight to the output block.
    tile_hw = o_ref.shape[-1]
    for lane_lo, lane_len in _lane_chunks(tile_hw, lane_chunk):
        s = _channel_sum(x_ref, c_total, lane_lo, lane_len, c_inner, unroll)
        o_ref[:, :, lane_lo:lane_lo + lane_len] = (s * inv_c).astype(o_ref.dtype)


def _avg_multi_kernel(x_ref, o_ref, acc_ref, *, c_total, c_tile, inv_c,
                      c_inner, lane_chunk, unroll):
    k = pl.program_id(2)
    last_k = pl.num_programs(2) - 1
    tile_hw = o_ref.shape[-1]
    rem = c_total % c_tile  # static

    @pl.when(k == 0)
    def _():
        acc_ref[...] = jnp.zeros_like(acc_ref)

    def accumulate(nrows):
        for lane_lo, lane_len in _lane_chunks(tile_hw, lane_chunk):
            sl = slice(lane_lo, lane_lo + lane_len)
            s = _channel_sum(x_ref, nrows, lane_lo, lane_len, c_inner, unroll)
            acc_ref[:, :, sl] = acc_ref[:, :, sl] + s

    if rem == 0:
        accumulate(c_tile)
    else:
        # Partial last channel block: rows >= rem are undefined (no HBM
        # padding) and must never be read.
        @pl.when(k != last_k)
        def _():
            accumulate(c_tile)

        @pl.when(k == last_k)
        def _():
            accumulate(rem)

    @pl.when(k == last_k)
    def _():
        # Static 1/C scale: exact mean over the true channel count.
        o_ref[...] = (acc_ref[...] * inv_c).astype(o_ref.dtype)


def avg_reduce(x):
    """Mean over axis 1 of an (N, C, H, W) array (== torch.mean(x, dim=1))."""
    n, c, h, w = x.shape
    hw = h * w
    x3 = x.reshape(n, c, hw)  # free reshape for contiguous NCHW

    # torch.mean requires a floating dtype; promote integer inputs to f32.
    out_dtype = x.dtype if jnp.issubdtype(x.dtype, jnp.floating) else jnp.float32
    itemsize = jnp.dtype(x.dtype).itemsize

    # Sublane packing: 8 rows per vreg for 32-bit, 16 for bf16, 32 for int8.
    c_inner = max(8, 8 * (4 // max(1, itemsize)))
    lane_chunk = 512
    unroll = 4

    # Per-chip VMEM-derived budgets (v7x: 64 MiB, v5e/v6e: 128 MiB).
    try:
        vmem_cap = int(getattr(pltpu.get_tpu_info(), "vmem_capacity_bytes",
                               64 * 1024 * 1024))
    except Exception:
        vmem_cap = 64 * 1024 * 1024
    vmem_limit = int(min((vmem_cap * 3) // 4, 96 * 1024 * 1024))
    target_block_bytes = max(1 << 20, min(vmem_limit // 3, 16 * 1024 * 1024))

    # Spatial tile: lane-dense, no HBM padding.  Either the full HW extent
    # (always legal) or a multiple-of-128 tile with an over-read tail block.
    max_tile_hw = 2048
    tile_hw = hw if hw <= max_tile_hw else max_tile_hw
    n_s = _cdiv(hw, tile_hw)

    # v7x megacore: guarantee at least 2 parallel grid steps.
    if n * n_s < 2 and hw >= 256:
        tile_hw = _round_up(_cdiv(hw, 2), 128)
        n_s = _cdiv(hw, tile_hw)

    # Channel tile: as large as the VMEM budget allows (fewer, larger DMAs);
    # near-divisor multiple of 8 when C does not fit a single block.
    bytes_per_row = tile_hw * itemsize
    c_tile_cap = max(c_inner, (target_block_bytes // bytes_per_row) // 8 * 8)
    if c <= c_tile_cap:
        c_tile = c
    else:
        c_tile = _round_up(_cdiv(c, _cdiv(c, c_tile_cap)), 8)
    n_k = _cdiv(c, c_tile)

    inv_c = float(1.0 / c)
    out_shape = jax.ShapeDtypeStruct((n, 1, hw), out_dtype)

    if n_k == 1:
        kernel = functools.partial(
            _avg_single_kernel, c_total=c, inv_c=inv_c, c_inner=c_inner,
            lane_chunk=lane_chunk, unroll=unroll)
        out3 = pl.pallas_call(
            kernel,
            out_shape=out_shape,
            grid_spec=pltpu.PrefetchScalarGridSpec(
                num_scalar_prefetch=0,
                grid=(n, n_s),
                in_specs=[pl.BlockSpec((1, c_tile, tile_hw),
                                       lambda b, s: (b, 0, s))],
                out_specs=pl.BlockSpec((1, 1, tile_hw),
                                       lambda b, s: (b, 0, s)),
            ),
            compiler_params=pltpu.CompilerParams(
                dimension_semantics=("parallel", "parallel"),
                vmem_limit_bytes=vmem_limit,
            ),
        )(x3)
    else:
        kernel = functools.partial(
            _avg_multi_kernel, c_total=c, c_tile=c_tile, inv_c=inv_c,
            c_inner=c_inner, lane_chunk=lane_chunk, unroll=unroll)
        out3 = pl.pallas_call(
            kernel,
            out_shape=out_shape,
            grid_spec=pltpu.PrefetchScalarGridSpec(
                num_scalar_prefetch=0,
                grid=(n, n_s, n_k),
                in_specs=[pl.BlockSpec((1, c_tile, tile_hw),
                                       lambda b, s, k: (b, k, s))],
                out_specs=pl.BlockSpec((1, 1, tile_hw),
                                       lambda b, s, k: (b, 0, s)),
                scratch_shapes=[pltpu.VMEM((1, 1, tile_hw), jnp.float32)],
            ),
            compiler_params=pltpu.CompilerParams(
                dimension_semantics=("parallel", "parallel", "arbitrary"),
                vmem_limit_bytes=vmem_limit,
            ),
        )(x3)

    return out3.reshape(n, h, w)


if __name__ == "__main__":
    key = jax.random.PRNGKey(0)
    # Small NCHW shape consistent with the module's forward.
    x = jax.random.normal(key, (2, 4, 16, 16), dtype=jnp.float32)

    out = jax.block_until_ready(avg_reduce(x))

    # Reference == torch.mean(x, dim=1).
    ref = jnp.mean(x, axis=1)
    assert out.shape == ref.shape == (2, 16, 16)
    assert jnp.allclose(out, ref, atol=1e-5, rtol=1e-5)

    print("KERNEL_OK")
</pallas_src>

<mosaic_0001>
module attributes {stable_mosaic.version = 11 : i64} {
  func.func @_avg_single_kernel(%arg0: i32, %arg1: i32, %arg2: memref<1x4x256xf32, #tpu.memory_space<vmem>>, %arg3: memref<1x1x256xf32, #tpu.memory_space<vmem>>) attributes {dimension_semantics = [#tpu.dimension_semantics<parallel>, #tpu.dimension_semantics<parallel>], iteration_bounds = array<i64: 2, 1>, scalar_prefetch = 0 : i64, scratch_operands = 0 : i64, tpu.core_type = #tpu.core_type<tc>, window_params = [{transform_indices = @transform_0, window_bounds = array<i64: 1, 4, 256>}, {transform_indices = @transform_1, window_bounds = array<i64: 1, 1, 256>}]} {
    %c0 = arith.constant 0 : index
    %c0_0 = arith.constant 0 : index
    %c0_1 = arith.constant 0 : index
    %0 = vector.load %arg2[%c0, %c0_0, %c0_1] : memref<1x4x256xf32, #tpu.memory_space<vmem>>, vector<1x4x256xf32>
    %cst = arith.constant dense<0.000000e+00> : vector<1x256xf32>
    %1 = vector.multi_reduction <add>, %0, %cst [1] : vector<1x4x256xf32> to vector<1x256xf32>
    %2 = vector.shape_cast %1 : vector<1x256xf32> to vector<1x1x256xf32>
    %cst_2 = arith.constant 2.500000e-01 : f32
    %3 = vector.broadcast %cst_2 : f32 to vector<1x1x256xf32>
    %4 = arith.mulf %2, %3 : vector<1x1x256xf32>
    %c0_3 = arith.constant 0 : index
    %c0_4 = arith.constant 0 : index
    %c0_5 = arith.constant 0 : index
    %5 = vector.load %arg3[%c0_3, %c0_4, %c0_5] : memref<1x1x256xf32, #tpu.memory_space<vmem>>, vector<1x1x256xf32>
    tpu.vector_store %arg3[%c0_3, %c0_4, %c0_5], %4 {strides = array<i32>} : memref<1x1x256xf32, #tpu.memory_space<vmem>>, vector<1x1x256xf32>,
    return
  }
  func.func @transform_0(%arg0: i32, %arg1: i32) -> (i32, i32, i32) {
    %c0_i32 = arith.constant 0 : i32
    %c0_i32_0 = arith.constant 0 : i32
    return %arg0, %c0_i32, %arg1 : i32, i32, i32
  }
  func.func @transform_1(%arg0: i32, %arg1: i32) -> (i32, i32, i32) {
    %c0_i32 = arith.constant 0 : i32
    %c0_i32_0 = arith.constant 0 : i32
    return %arg0, %c0_i32, %arg1 : i32, i32, i32
  }
}

</mosaic_0001>

<bundles_post_ra>
// kernel: tpu_custom_call.1
= control target key start
LH: loop header
LB: loop body
LE: loop exit
PB: predicated region body
PF: predicated region fallthrough
CT: control target
= control target key end

     0   :  { %6 = vsyncpa [#allocation3], 0  ;;  %s679_s0 = inlined_call_operand.hbm [shape: f32[2,4,256], index: 0, kind: input, shape index: {}]   ;;  %s680_s1 = inlined_call_operand.hbm [shape: f32[2,1,256], index: 1, kind: output, shape index: {}]  }
   0x1   :  { %8 = vsyncpa [#allocation3 + $0x1], 0 }
   0x2   :  { %9 = vsyncpa [#allocation4], 0 }
   0x3   :  { %11 = vsyncpa [#allocation4 + $0x1], 0  ;;  %s506_s6 = smov 0   ;;  %s508_s7 = smov 0  }
   0x4   :  { %s510_s8 = smov 0   ;;  %s512_s9 = smov 0  }
   0x5   :  { %s514_s10 = smov 0   ;;  %s516_s11 = smov 0  }
   0x6 LB: > { %s298_s12 = sadd.s32 4294967295, %s491_s11   ;;  %s299_s13 = sadd.s32 4294967294, %s491_s11   ;;  %s491_s11 = sphi %s516_s11, %s17_s11   ;;  %s487_s10 = sphi %s514_s10, %s696_s10   ;;  %s483_s9 = sphi %s512_s9, %s695_s9   ;;  %s479_s8 = sphi %s510_s8, %s694_s8   ;;  %s475_s7 = sphi %s508_s7, %s693_s7   ;;  %s471_s6 = sphi %s506_s6, %s692_s6  }
   0x7   : > { %s29_s14 = sadd.s32 1, %s487_s10  ;;  %s38_s15 = sadd.s32 1, %s479_s8 }
   0x8   : > { %p31_p0 = scmp.ge.s32.totalorder %s29_s14, 2  ;;  %p45_p1 = scmp.ne.s32.totalorder %s479_s8, %s475_s7 }
   0x9   : > { %p46_p2 = scmp.eq.s32.totalorder %s491_s11, 0  ;;  %p51_p3 = scmp.ne.s32.totalorder %s475_s7, %s471_s6 }
   0xa   : > { %s698_s14 = smov (%p31_p0, %s29_s14), 0  ;;  %p52_p5 = scmp.eq.s32.totalorder %s298_s12, 0 }
   0xb   : > { %p547_p4 = por %p46_p2, %p45_p1  ;;  %s33_s17 = ssub.s32 %s487_s10, %s698_s14 }
   0xc   : > { %p77_p6 = scmp.eq.s32.totalorder %s298_s12, 1  ;;  %p36_p7 = scmp.eq.s32.totalorder %s33_s17, 0 }
   0xd   : > { %p553_p8 = por %p52_p5, %p51_p3  ;;  %p83_p10 = scmp.eq.s32.totalorder %s299_s13, 1 }
   0xe   : > { %p557_p9 = por %p77_p6, %p45_p1  ;;  %p327_p13 = scmp.lt.s32.totalorder %s491_s11, 2 }
   0xf   : > { %s562_s20 = scalar_select %p36_p7, %s479_s8, %s38_s15  }
  0x10   : > { %s684_s19 = scalar_select %p557_p9, 1, 0 }
  0x11   : > { %p564_p11 = por %p83_p10, %p51_p3  ;;  %s103_s22 = sand.u32 1, %s479_s8  }
  0x12   : > { %s302_s23 = sshll.u32 %s103_s22, 3  ;;  %s313_s24 = sshll.u32 %s487_s10, 7 }
  0x13   : > { %s685_s21 = scalar_select %p564_p11, 1, 0 }
  0x14   : > { %s575_s27 = scalar_lea.hbm %s679_s0, %s313_s24  ;;  %s107_s28 = scalar_lea.vmem [#allocation2], %s302_s23 }
  0x15   : > { %s117_s29 = sshll.u32 %s107_s28, 4  ;;  %p581_p0 = pnand %p327_p13, %p547_p4  ;;  %s577_s29 = int_to_ptr.vmem [resolvable:$true] %s117_s29 }
  0x16   : > { %s104_s2 = scalar_lea.sflag [#allocation3], %s103_s22  ;;  %s379_s3 = scalar_lea.hbm %s575_s27, 128 }
  0x17   : > { %p380_p3 = scmp.ne.s32.totalorder %s575_s27, %s379_s3  ;;  %p381_p5 = pneg %p581_p0 }
  0x18   : > { %s384_s12 = scalar_lea.hbm %s679_s0, 256  ;;  %p385_p4 = scmp.lt.u32.totalorder %s575_s27, %s679_s0 }
  0x19   : > { %p382_p6 = pnand %p381_p5, %p380_p3  ;;  %p386_p10 = scmp.lt.u32.totalorder %s384_s12, %s379_s3 }
  0x1a   : > { %p388_p12 = scmp.lt.u32.totalorder %s379_s3, %s575_s27 }
  0x1b   : > { %p383_p7 = pneg %p382_p6  ;;  %p387_p13 = por %p386_p10, %p385_p4 }
  0x1d   : > { %p389_p1 = por %p388_p12, %p387_p13 }
  0x1f   : > { %p390_p2 = pnand %p389_p1, %p383_p7 }
  0x21   : > { %393 = shalt.err (!%p390_p2)
}
  0x22   : > { %s394_s16 = scalar_lea.vmem %s577_s29, 128  ;;  %s493_s17 = smov [#allocation2]  }
  0x23   : > { %p395_p3 = scmp.ne.s32.totalorder %s577_s29, %s394_s16  ;;  %s399_s22 = sshll.u32 %s493_s17, 4  ;;  %s400_s22 = int_to_ptr.vmem [resolvable:$false] %s399_s22 }
  0x24   : > { %s401_s23 = scalar_lea.vmem %s400_s22, 256  ;;  %p402_p9 = scmp.lt.s32.totalorder %s577_s29, %s400_s22 }
  0x25   : > { %p397_p6 = pnand %p395_p3, %p381_p5  ;;  %p403_p4 = scmp.lt.s32.totalorder %s401_s23, %s394_s16 }
  0x27   : > { %p398_p11 = pneg %p397_p6  ;;  %p404_p10 = por %p403_p4, %p402_p9 }
  0x29   : > { %p405_p12 = pnand %p404_p10, %p398_p11 }
  0x2b   : > { %408 = shalt.err (!%p405_p12)
}
  0x2c   : > { %322 = dma.hbm_to_vmem [thread:$0]  (!%p581_p0), %s575_s27, 128, %s577_s29, %s104_s2  }
  0x2d   : > { %p687_p1 = scmp.lt.s32.totalorder %s491_s11, 3  ;;  %p688_p2 = scmp.ge.s32.totalorder %s491_s11, 1 }
  0x2f   : > { %p123_p5 = pnand %p688_p2, %p687_p1 }
  0x30   : > { %s617_s24 = sand.u32 (!%p123_p5), 1, %s475_s7  }
  0x31   : > { %126 = sbr.rel (%p123_p5) target bundleno = 95 (0x5f), region = 24  ;;  %s306_s25 = sshll.u32 (!%p123_p5), %s617_s24, 3 }
  0x32   : > { %s129_s26 = scalar_lea.sflag (!%p123_p5), [#allocation3], %s617_s24  ;;  %s132_s28 = scalar_lea.vmem (!%p123_p5), [#allocation2], %s306_s25 }
  0x38   : > { %462 = dma.done.wait (%p553_p8), %s129_s26, 128  }
  0x39   : > { %464 = vsyncadd (%p553_p8), %s129_s26, 4294967168  ;;  %vm157_vm0 = vcmask 1043456   ;;  %v153_v0 = vld [vmem:[%s132_s28] sm:$0xff]  ;;  %v494_v11 = vmov 1966171168   ;;  %v180_v13 = vlaneseq  ;;  %s307_s18 = sshll.u32 %s617_s24, 1 }
  0x3a   : > { %v155_v1 = vcombine.high %v153_v0, %v153_v0  ;;  %v158_v2 = vsel %vm157_vm0, %v153_v0, 0.0  ;;  %v178_v12 = vunpack.c.l.s4 %v494_v11  ;;  %s150_s27 = scalar_lea.vmem [#allocation5], %s307_s18  ;;  %s314_s30 = sshll.u32 %s483_s9, 5 }
  0x3b   : > { %v159_v3 = vrot.slane %v158_v2, 4  ;;  %v181_v19 = vshrl.u32 %v180_v13, 7  ;;  %s214_s29 = sshll.u32 %s150_s27, 4  ;;  %vm194_vm1 = vcmp.lt.s32.totalorder %v180_v13, 256  ;;  %s632_s4 = scalar_lea.hbm %s680_s1, %s314_s30  ;;  %s627_s29 = int_to_ptr.vmem [resolvable:$true] %s214_s29 }
  0x3c   : > { %v165_v4 = vsel %vm157_vm0, %v155_v1, 0.0  ;;  %v179_v18 = vunpack.c.0.s8 %v178_v12  ;;  %s198_s5 = scalar_lea.sflag [#allocation4], %s617_s24  ;;  %s409_s12 = scalar_lea.vmem %s627_s29, 32 }
  0x3d   : > { %v160_v5 = vadd.f32 %v159_v3, %v158_v2  ;;  %v166_v6 = vrot.slane %v165_v4, 4  ;;  %p410_p8 = scmp.ne.s32.totalorder %s627_s29, %s409_s12  ;;  %p689_p9 = scmp.ne.s32.totalorder %s684_s19, 0 }
  0x3e   : > { %v182_v23 = vsub.s32 %v179_v18, %v181_v19  ;;  %s495_s9 = smov [#allocation5]  }
  0x3f   : > { %v161_v7 = vrot.slane %v160_v5, 2  ;;  %v167_v8 = vadd.f32 %v166_v6, %v165_v4  ;;  %p411_p11 = pnand %p410_p8, %p689_p9  ;;  %s413_s13 = sshll.u32 %s495_s9, 4  ;;  %s414_s13 = int_to_ptr.vmem [resolvable:$false] %s413_s13 }
  0x40   : > { %s415_s15 = scalar_lea.vmem %s414_s13, 64  ;;  %p416_p7 = scmp.lt.s32.totalorder %s627_s29, %s414_s13 }
  0x41   : > { %v162_v9 = vadd.f32 %v161_v7, %v160_v5  ;;  %v168_v10 = vrot.slane %v167_v8, 2  ;;  %p412_p0 = pneg %p411_p11  ;;  %p417_p13 = scmp.lt.s32.totalorder %s415_s15, %s409_s12 }
  0x43   : > { %v163_v14 = vrot.slane %v162_v9, 1  ;;  %v169_v15 = vadd.f32 %v168_v10, %v167_v8  ;;  %p418_p3 = por %p417_p13, %p416_p7 }
  0x45   : > { %v164_v16 = vadd.f32 %v163_v14, %v162_v9  ;;  %v170_v17 = vrot.slane %v169_v15, 1  ;;  %p419_p6 = pnand %p418_p3, %p412_p0 }
  0x47   : > { %v171_v20 = vadd.f32 %v170_v17, %v169_v15  ;;  %v172_v21 = vmul.f32 0.25, %v164_v16 }
  0x49   : > { %v173_v22 = vmul.f32 0.25, %v171_v20 }
  0x4b   : > { %v176_v24 = vcombine.low %v172_v21, %v173_v22 }
  0x4d   : > { %v183_v25 = vrot.slane %v176_v24, %v182_v23 }
  0x4f   : > { %v190_v26 = vrot.slane %v183_v25, %v182_v23 }
  0x51   : > { %196 = vst.msk [vmem:[%s150_s27] sm:$0x3] %vm194_vm1, %v190_v26 }
  0x52   : > { %422 = shalt.err (!%p419_p6)
}
  0x53   : > { %s423_s16 = scalar_lea.hbm %s632_s4, 32  ;;  %s427_s23 = scalar_lea.hbm %s680_s1, 64 }
  0x54   : > { %p424_p4 = scmp.ne.s32.totalorder %s632_s4, %s423_s16  ;;  %p428_p1 = scmp.lt.u32.totalorder %s632_s4, %s680_s1 }
  0x55   : > { %p429_p2 = scmp.lt.u32.totalorder %s427_s23, %s423_s16  ;;  %p431_p8 = scmp.lt.u32.totalorder %s423_s16, %s632_s4 }
  0x56   : > { %p425_p10 = pnand %p424_p4, %p689_p9 }
  0x57   : > { %p430_p5 = por %p429_p2, %p428_p1 }
  0x58   : > { %p426_p12 = pneg %p425_p10 }
  0x59   : > { %p432_p11 = por %p431_p8, %p430_p5 }
  0x5b   : > { %p433_p0 = pnand %p432_p11, %p426_p12 }
  0x5d   : > { %436 = shalt.err (!%p433_p0)
}
  0x5e   : > { %317 = dma.vmem_to_hbm [thread:$0]  (%p689_p9), %s627_s29, 32, %s632_s4, %s198_s5  }
  0x5f PF: > { %s226_s26 = sand.u32 1, %s471_s6   ;;  %p690_p7 = scmp.ne.s32.totalorder %s685_s21, 0 }
  0x60   : > { %p691_p13 = scmp.ge.s32.totalorder %s491_s11, 2  ;;  %s227_s28 = scalar_lea.sflag [#allocation4], %s226_s26 }
  0x62   : > { %p324_p3 = pnand %p691_p13, %p690_p7 }
  0x64   : > { %466 = dma.done.wait (!%p324_p3), %s227_s28, 32  }
  0x65   : > { %468 = vsyncadd (!%p324_p3), %s227_s28, 4294967264  ;;  %s17_s11 = sadd.s32 1, %s491_s11   ;;  %s692_s6 = smov %s475_s7 }
  0x66   : > { %p14_p6 = scmp.ge.s32.totalorder %s17_s11, 4   ;;  %s693_s7 = smov %s479_s8 }
  0x67   : > { %s694_s8 = smov %s562_s20  ;;  %s695_s9 = smov %s487_s10 }
  0x68   : > { %s696_s10 = smov %s698_s14  ;;  %16 = sbr.rel (!%p14_p6) target bundleno = 6 (0x6), region = 69 }
  0x6f   :  { %232 = vsyncpa [#allocation3], 1 }
  0x70   :  { %234 = vsyncpa [#allocation3 + $0x1], 1 }
  0x71   :  { %235 = vsyncpa [#allocation4], 1 }
  0x72   :  { %237 = vsyncpa [#allocation4 + $0x1], 1 }

</bundles_post_ra>
